<compile_context>
chip_gen: v5e
topology: v5e:2x2
jax: 0.10.0
libtpu: 0.0.40
codegen_flags: <defaults>
</compile_context>

<pallas_src>
import functools

import jax
import jax.numpy as jnp
from jax import lax
from jax.experimental import pallas as pl
from jax.experimental.pallas import tpu as pltpu


_LANES = 512        # lane-dense last dim (multiple of 128) -> unmasked full-width stores
_BLOCK_ROWS = 1024  # (1024, 512) f32 block = 2 MiB/buffer; ~8 MiB double-buffered in+out


def _dropout_kernel(seed_ref, x_ref, o_ref, *, p: float):
    """Elementwise dropout on one (block_rows, lanes) tile.

    Mask bits come from a stateless hash (lowbias32) of the element's global
    flat index, so the mask does not depend on the tiling or grid order.
    """
    block_rows, lanes = x_ref.shape

    # Global flat element index for every element of this tile (mod 2^32;
    # the mask would only repeat past 4B elements, which is irrelevant here).
    row = lax.broadcasted_iota(jnp.uint32, (block_rows, lanes), 0)
    col = lax.broadcasted_iota(jnp.uint32, (block_rows, lanes), 1)
    base_row = pl.program_id(0).astype(jnp.uint32) * jnp.uint32(block_rows)
    idx = (base_row + row) * jnp.uint32(lanes) + col

    # lowbias32-style integer mixer, seeded from the SMEM scalar.
    h = idx + seed_ref[0].astype(jnp.uint32) * jnp.uint32(0x9E3779B9)
    h = h ^ (h >> 16)
    h = h * jnp.uint32(0x7FEB352D)
    h = h ^ (h >> 15)
    h = h * jnp.uint32(0x846CA68B)
    h = h ^ (h >> 16)

    # Drop with probability p: drop iff h < p * 2^32 (tiny underestimate of p
    # only when p is within 2^-32 of 1.0 -- negligible).
    threshold = jnp.uint32(min(int(round(p * 2.0 ** 32)), 2 ** 32 - 1))
    keep = h >= threshold

    # Native-dtype compute; fold 1/(1-p) into the select -> one select + one mul.
    scale = jnp.asarray(1.0 / (1.0 - p), dtype=x_ref.dtype)
    zero = jnp.asarray(0.0, dtype=x_ref.dtype)
    o_ref[...] = x_ref[...] * jnp.where(keep, scale, zero)


def pallas_dropout(x: jax.Array, *, p: float = 0.5, seed: int = 0,
                   training: bool = True) -> jax.Array:
    """Dropout forward matching nn.Dropout(p) on a tensor of any shape.

    NOTE: the mask is a deterministic function of (seed, element index);
    callers must thread a fresh seed per training step.
    """
    if not training or p <= 0.0:
        return x
    if p >= 1.0:
        # Everything dropped; 1/(1-p) would blow up, so short-circuit.
        return jnp.zeros_like(x)

    orig_shape = x.shape
    total = x.size
    lanes = _LANES

    rows = pl.cdiv(total, lanes)
    if rows <= _BLOCK_ROWS:
        # Single block covering the full (rows, lanes) slab. Full-extent
        # blocks are exempt from the (8, 128) divisibility rule.
        block_rows = rows
        rows_padded = rows
    else:
        block_rows = _BLOCK_ROWS
        rows_padded = pl.cdiv(rows, _BLOCK_ROWS) * _BLOCK_ROWS
    padded_total = rows_padded * lanes

    xf = x.reshape(-1)
    if padded_total != total:
        xf = jnp.pad(xf, (0, padded_total - total))
    x2d = xf.reshape(rows_padded, lanes)

    n_blocks = rows_padded // block_rows
    seed_arr = jnp.asarray([seed], dtype=jnp.int32)

    out2d = pl.pallas_call(
        functools.partial(_dropout_kernel, p=p),
        out_shape=jax.ShapeDtypeStruct((rows_padded, lanes), x.dtype),
        grid_spec=pltpu.PrefetchScalarGridSpec(
            num_scalar_prefetch=1,          # seed lives in SMEM
            grid=(n_blocks,),
            in_specs=[pl.BlockSpec((block_rows, lanes), lambda i, seed: (i, 0))],
            out_specs=pl.BlockSpec((block_rows, lanes), lambda i, seed: (i, 0)),
        ),
        compiler_params=pltpu.CompilerParams(
            # Tiles are fully independent (hash-based mask), so the grid axis
            # is parallel -> shards across both TensorCores on v7x.
            dimension_semantics=("parallel",),
        ),
    )(seed_arr, x2d)

    out = out2d.reshape(-1)
    if padded_total != total:
        out = out[:total]
    return out.reshape(orig_shape)


class DropOut:
    """JAX/Pallas equivalent of the PyTorch DropOut module."""

    def __init__(self, in_channels, out_channels, keep_prob=0.5):
        # in_channels / out_channels are unused by the original module too.
        # `keep_prob` is faithfully forwarded as the *drop* probability,
        # exactly like the original code does with nn.Dropout(keep_prob).
        self.p = keep_prob

    def __call__(self, x, *, seed: int = 0, training: bool = True):
        return pallas_dropout(x, p=self.p, seed=seed, training=training)


if __name__ == "__main__":
    key = jax.random.PRNGKey(0)
    # Small NCHW input: batch=2, channels=4, spatial=16x16.
    x = jax.random.normal(key, (2, 4, 16, 16), dtype=jnp.float32)

    module = DropOut(in_channels=4, out_channels=4, keep_prob=0.5)
    y = jax.block_until_ready(module(x, seed=42, training=True))

    # Sanity checks: shape/dtype preserved; survivors are exactly x / (1-p) = 2x.
    assert y.shape == x.shape and y.dtype == x.dtype
    kept = y != 0
    assert bool(jnp.allclose(jnp.where(kept, y, 0.0),
                             jnp.where(kept, 2.0 * x, 0.0), atol=1e-5))
    # Kept fraction should be roughly 1 - p = 0.5 (loose, deterministic bound).
    frac_kept = float(jnp.mean(kept.astype(jnp.float32)))
    assert 0.35 < frac_kept < 0.65, frac_kept

    # Non-multiple-of-128 element count exercises the padding path.
    x_odd = jax.random.normal(jax.random.PRNGKey(1), (2, 3, 7, 5), dtype=jnp.float32)
    y_odd = jax.block_until_ready(module(x_odd, seed=7, training=True))
    kept_odd = y_odd != 0
    assert y_odd.shape == x_odd.shape
    assert bool(jnp.allclose(jnp.where(kept_odd, y_odd, 0.0),
                             jnp.where(kept_odd, 2.0 * x_odd, 0.0), atol=1e-5))

    # Eval mode is the identity.
    y_eval = jax.block_until_ready(module(x, training=False))
    assert bool(jnp.array_equal(y_eval, x))

    print("KERNEL_OK")
</pallas_src>

<mosaic_0001>
module attributes {stable_mosaic.version = 11 : i64} {
  func.func @_dropout_kernel(%arg0: i32, %arg1: memref<1xi32, #tpu.memory_space<smem>>, %arg2: memref<4x512xf32, #tpu.memory_space<vmem>>, %arg3: memref<4x512xf32, #tpu.memory_space<vmem>>) attributes {dimension_semantics = [#tpu.dimension_semantics<parallel>], iteration_bounds = array<i64: 1>, scalar_prefetch = 1 : i64, scratch_operands = 0 : i64, tpu.core_type = #tpu.core_type<tc>, window_params = [{transform_indices = @transform_0, window_bounds = array<i64: 4, 512>}, {transform_indices = @transform_1, window_bounds = array<i64: 4, 512>}]} {
    %0 = tpu.iota {dimensions = array<i32: 0>} : vector<4x512xi32>
    %1 = tpu.iota {dimensions = array<i32: 1>} : vector<4x512xi32>
    %c4_i32 = arith.constant 4 : i32
    %2 = arith.muli %arg0, %c4_i32 : i32
    %3 = vector.broadcast %2 : i32 to vector<4x512xi32>
    %4 = arith.addi %3, %0 : vector<4x512xi32>
    %c512_i32 = arith.constant 512 : i32
    %5 = vector.broadcast %c512_i32 : i32 to vector<4x512xi32>
    %6 = arith.muli %4, %5 : vector<4x512xi32>
    %7 = arith.addi %6, %1 : vector<4x512xi32>
    %c0 = arith.constant 0 : index
    %8 = memref.load %arg1[%c0] : memref<1xi32, #tpu.memory_space<smem>>
    %c-1640531527_i32 = arith.constant -1640531527 : i32
    %9 = arith.muli %8, %c-1640531527_i32 : i32
    %10 = vector.broadcast %9 : i32 to vector<4x512xi32>
    %11 = arith.addi %7, %10 : vector<4x512xi32>
    %c16_i32 = arith.constant 16 : i32
    %12 = vector.broadcast %c16_i32 : i32 to vector<4x512xi32>
    %13 = arith.shrui %11, %12 : vector<4x512xi32>
    %14 = arith.xori %11, %13 : vector<4x512xi32>
    %c2146121005_i32 = arith.constant 2146121005 : i32
    %15 = vector.broadcast %c2146121005_i32 : i32 to vector<4x512xi32>
    %16 = arith.muli %14, %15 : vector<4x512xi32>
    %c15_i32 = arith.constant 15 : i32
    %17 = vector.broadcast %c15_i32 : i32 to vector<4x512xi32>
    %18 = arith.shrui %16, %17 : vector<4x512xi32>
    %19 = arith.xori %16, %18 : vector<4x512xi32>
    %c-2073254261_i32 = arith.constant -2073254261 : i32
    %20 = vector.broadcast %c-2073254261_i32 : i32 to vector<4x512xi32>
    %21 = arith.muli %19, %20 : vector<4x512xi32>
    %c16_i32_0 = arith.constant 16 : i32
    %22 = vector.broadcast %c16_i32_0 : i32 to vector<4x512xi32>
    %23 = arith.shrui %21, %22 : vector<4x512xi32>
    %24 = arith.xori %21, %23 : vector<4x512xi32>
    %c-2147483648_i32 = arith.constant -2147483648 : i32
    %25 = vector.broadcast %c-2147483648_i32 : i32 to vector<4x512xi32>
    %26 = arith.cmpi uge, %24, %25 : vector<4x512xi32>
    %c0_1 = arith.constant 0 : index
    %c0_2 = arith.constant 0 : index
    %27 = vector.load %arg2[%c0_1, %c0_2] : memref<4x512xf32, #tpu.memory_space<vmem>>, vector<4x512xf32>
    %cst = arith.constant 2.000000e+00 : f32
    %cst_3 = arith.constant 0.000000e+00 : f32
    %28 = vector.broadcast %cst : f32 to vector<4x512xf32>
    %29 = vector.broadcast %cst_3 : f32 to vector<4x512xf32>
    %30 = arith.select %26, %28, %29 : vector<4x512xi1>, vector<4x512xf32>
    %31 = arith.mulf %27, %30 : vector<4x512xf32>
    %c0_4 = arith.constant 0 : index
    %c0_5 = arith.constant 0 : index
    %32 = vector.load %arg3[%c0_4, %c0_5] : memref<4x512xf32, #tpu.memory_space<vmem>>, vector<4x512xf32>
    tpu.vector_store %arg3[%c0_4, %c0_5], %31 {strides = array<i32>} : memref<4x512xf32, #tpu.memory_space<vmem>>, vector<4x512xf32>,
    return
  }
  func.func @transform_0(%arg0: i32, %arg1: memref<1xi32, #tpu.memory_space<smem>>) -> (i32, i32) {
    %c0_i32 = arith.constant 0 : i32
    %c0_i32_0 = arith.constant 0 : i32
    return %arg0, %c0_i32 : i32, i32
  }
  func.func @transform_1(%arg0: i32, %arg1: memref<1xi32, #tpu.memory_space<smem>>) -> (i32, i32) {
    %c0_i32 = arith.constant 0 : i32
    %c0_i32_0 = arith.constant 0 : i32
    return %arg0, %c0_i32 : i32, i32
  }
}

</mosaic_0001>

<bundles_post_ra>
// kernel: tpu_custom_call.1
= control target key start
LH: loop header
LB: loop body
LE: loop exit
PB: predicated region body
PF: predicated region fallthrough
CT: control target
= control target key end

     0   :  { %8 = vsyncpa [#allocation5], 0  ;;  %s215_s0 = inlined_call_operand.<no memory space> [shape: s32[1], index: 0, kind: input, shape index: {}]   ;;  %s216_s1 = inlined_call_operand.hbm [shape: f32[4,512], index: 1, kind: input, shape index: {}]   ;;  %s217_s2 = inlined_call_operand.hbm [shape: f32[4,512], index: 2, kind: output, shape index: {}]  }
   0x1   :  { %9 = vsyncpa [#allocation6], 0  ;;  %s15_s11 = sshll.u32 %s216_s1, 4  ;;  %s188_s12 = smov [#allocation4]   ;;  %s16_s11 = int_to_ptr.hbm [resolvable:$true] %s15_s11 }
   0x2   :  { %s17_s13 = sshll.u32 %s188_s12, 4  ;;  %s18_s13 = int_to_ptr.vmem [resolvable:$true] %s17_s13 }
   0x3   :  { %20 = dma.hbm_to_vmem [thread:$0]  %s16_s11, 256, %s18_s13, [#allocation5]  }
   0x4   :  { %184 = dma.done.wait [#allocation5], 256  }
   0x5   :  { %185 = vsyncadd [#allocation5], 4294967040  ;;  %v25_v0 = vlaneseq  ;;  %s41_s16 = smul.u32 2654435769, %s215_s0  ;;  %v189_v52 = vmov 0.0   ;;  %vm103_vm3 = vcmask 1043456  }
   0x6   :  { %v91_v55 = vld [vmem:[#allocation4] sm:$0xff]  ;;  %v92_v59 = vld [vmem:[#allocation4 + $0x8] sm:$0xff]  ;;  %s190_s0 = smov [#allocation7]   ;;  %s119_s19 = sshll.u32 %s217_s2, 4  ;;  %s120_s19 = int_to_ptr.hbm [resolvable:$true] %s119_s19 }
   0x7   :  { %v26_v1 = vshrl.u32 %v25_v0, 7  ;;  %v28_v2 = vand.u32 127, %v25_v0  ;;  %v42_v7 = vstv %s41_s16  ;;  %s117_s1 = sshll.u32 %s190_s0, 4  ;;  %s118_s1 = int_to_ptr.vmem [resolvable:$true] %s117_s1 }
   0x9   :  { %v29_v3 = vadd.s32 128, %v28_v2  ;;  %v35_v4 = vmul.u32 512, %v26_v1  ;;  %v30_v5 = vadd.s32 256, %v28_v2  ;;  %v31_v6 = vadd.s32 384, %v28_v2 }
   0xb   :  { %v36_v8 = vadd.s32 %v35_v4, %v28_v2  ;;  %v37_v9 = vadd.s32 %v35_v4, %v29_v3  ;;  %v38_v10 = vadd.s32 %v35_v4, %v30_v5  ;;  %v39_v11 = vadd.s32 %v35_v4, %v31_v6 }
   0xd   :  { %v43_v12 = vadd.s32 %v42_v7, %v36_v8  ;;  %v44_v13 = vadd.s32 %v42_v7, %v37_v9  ;;  %v45_v14 = vadd.s32 %v42_v7, %v38_v10  ;;  %v46_v15 = vadd.s32 %v42_v7, %v39_v11 }
   0xf   :  { %v47_v16 = vshrl.u32 %v43_v12, 16  ;;  %v48_v17 = vshrl.u32 %v44_v13, 16  ;;  %v49_v18 = vshrl.u32 %v45_v14, 16  ;;  %v50_v19 = vshrl.u32 %v46_v15, 16 }
  0x11   :  { %v51_v20 = vxor.u32 %v47_v16, %v43_v12  ;;  %v52_v21 = vxor.u32 %v48_v17, %v44_v13  ;;  %v53_v22 = vxor.u32 %v49_v18, %v45_v14  ;;  %v54_v23 = vxor.u32 %v50_v19, %v46_v15 }
  0x13   :  { %v55_v24 = vmul.u32 2146121005, %v51_v20  ;;  %v56_v25 = vmul.u32 2146121005, %v52_v21  ;;  %v57_v26 = vmul.u32 2146121005, %v53_v22 }
  0x14   :  { %v58_v27 = vmul.u32 2146121005, %v54_v23 }
  0x15   :  { %v59_v28 = vshrl.u32 %v55_v24, 15  ;;  %v60_v29 = vshrl.u32 %v56_v25, 15  ;;  %v61_v30 = vshrl.u32 %v57_v26, 15 }
  0x16   :  { %v62_v31 = vshrl.u32 %v58_v27, 15 }
  0x17   :  { %v63_v32 = vxor.u32 %v59_v28, %v55_v24  ;;  %v64_v33 = vxor.u32 %v60_v29, %v56_v25  ;;  %v65_v34 = vxor.u32 %v61_v30, %v57_v26 }
  0x18   :  { %v66_v35 = vxor.u32 %v62_v31, %v58_v27 }
  0x19   :  { %v67_v36 = vmul.u32 2221713035, %v63_v32  ;;  %v68_v37 = vmul.u32 2221713035, %v64_v33  ;;  %v69_v38 = vmul.u32 2221713035, %v65_v34 }
  0x1a   :  { %v70_v39 = vmul.u32 2221713035, %v66_v35 }
  0x1b   :  { %v71_v40 = vshrl.u32 %v67_v36, 16  ;;  %v72_v41 = vshrl.u32 %v68_v37, 16  ;;  %v73_v42 = vshrl.u32 %v69_v38, 16 }
  0x1c   :  { %v74_v43 = vshrl.u32 %v70_v39, 16 }
  0x1d   :  { %v75_v44 = vxor.u32 %v71_v40, %v67_v36  ;;  %v76_v45 = vxor.u32 %v72_v41, %v68_v37  ;;  %v77_v46 = vxor.u32 %v73_v42, %v69_v38 }
  0x1e   :  { %v78_v47 = vxor.u32 %v74_v43, %v70_v39 }
  0x1f   :  { %v129_v48 = vxor.u32 2147483648, %v75_v44  ;;  %v130_v49 = vxor.u32 2147483648, %v76_v45  ;;  %v131_v50 = vxor.u32 2147483648, %v77_v46 }
  0x20   :  { %v132_v51 = vxor.u32 2147483648, %v78_v47 }
  0x21   :  { %vm81_vm0 = vcmp.ge.s32.totalorder %v129_v48, 0  ;;  %vm84_vm1 = vcmp.ge.s32.totalorder %v130_v49, 0  ;;  %vm87_vm2 = vcmp.ge.s32.totalorder %v131_v50, 0 }
  0x22   :  { %v93_v53 = vsel %vm81_vm0, 2.0, %v189_v52  ;;  %v94_v54 = vsel %vm84_vm1, 2.0, %v189_v52  ;;  %vm90_vm4 = vcmp.ge.s32.totalorder %v132_v51, 0  ;;  %v95_v57 = vsel %vm87_vm2, 2.0, %v189_v52 }
  0x23   :  { %v101_v56 = vrot.slane %v94_v54, 4  ;;  %v96_v58 = vsel %vm90_vm4, 2.0, %v189_v52 }
  0x24   :  { %v102_v60 = vrot.slane %v96_v58, 4 }
  0x25   :  { %v104_v61 = vsel %vm103_vm3, %v93_v53, %v101_v56 }
  0x26   :  { %v108_v62 = vmul.f32 %v104_v61, %v91_v55  ;;  %v105_v63 = vsel %vm103_vm3, %v95_v57, %v102_v60 }
  0x27   :  { %v109_v0 = vmul.f32 %v105_v63, %v92_v59 }
  0x28   :  { %110 = vst [vmem:[#allocation7] sm:$0xff] %v108_v62 }
  0x29   :  { %111 = vst [vmem:[#allocation7 + $0x8] sm:$0xff] %v109_v0 }
  0x2a   :  { %122 = dma.vmem_to_hbm [thread:$0]  %s118_s1, 256, %s120_s19, [#allocation6]  }
  0x2b   :  { %186 = dma.done.wait [#allocation6], 256  }
  0x2c   :  { %187 = vsyncadd [#allocation6], 4294967040 }
  0x2d   :  { %127 = vsyncpa [#allocation5], 1 }
  0x2e   :  { %128 = vsyncpa [#allocation6], 1 }

</bundles_post_ra>
